<compile_context>
chip_gen: v5e
topology: v5e:2x2
jax: 0.10.0
libtpu: 0.0.40
codegen_flags: <defaults>
</compile_context>

<pallas_src>
import jax
import jax.numpy as jnp
from jax.experimental import pallas as pl
from jax.experimental.pallas import tpu as pltpu

IN_FEATURES = 20
OUT_FEATURES = 4

# Rows packed per grouped row: 6 * 20 = 120 contraction lanes (<= 128).
GROUP = 6
IN_G = GROUP * IN_FEATURES      # 120
OUT_G = GROUP * OUT_FEATURES    # 24

# Grouped rows per grid step (= 6 * 2048 = 12288 original rows).  VMEM per step:
#   x block : 2048 x 128 (lane-padded from 120) x 4 B = 1 MiB
#   y block : 2048 x 128 (lane-padded from  24) x 4 B = 1 MiB
# double-buffered -> ~4 MiB, well under the scoped-VMEM limit on all chips.
MAX_TILE_G = 2048


def _linear_grouped_kernel(xg_ref, wg_ref, bg_ref, og_ref):
    # One MXU matmul with a ~dense contraction dim (f32 accumulation) + VPU bias add.
    acc = jnp.dot(xg_ref[...], wg_ref[...], preferred_element_type=jnp.float32)
    og_ref[...] = (acc + bg_ref[...]).astype(og_ref.dtype)


def _round_up(v, m):
    return ((v + m - 1) // m) * m


def patchifier_forward(x, weight, bias):
    """Equivalent of Patchifier().forward(x) == nn.Linear(20, 4)(x).

    x      : (..., 20)  float32
    weight : (4, 20)    float32   (PyTorch convention: out_features x in_features)
    bias   : (4,)       float32
    returns: (..., 4)   float32
    """
    orig_shape = x.shape
    n = 1
    for d in orig_shape[:-1]:
        n *= d
    x2d = x.reshape(n, IN_FEATURES)

    # --- tiling of the grouped-row axis ----------------------------------------
    n_g = pl.cdiv(n, GROUP)                               # grouped rows needed
    tile_g = min(MAX_TILE_G, _round_up(max(n_g, 1), 8))   # sublane multiple of 8
    n_g_pad = _round_up(n_g, tile_g)
    n_pad = n_g_pad * GROUP
    if n_pad != n:
        x2d = jnp.pad(x2d, ((0, n_pad - n), (0, 0)))      # zero rows, sliced off later

    # Free row-major reshape: (n_pad, 20) -> (n_g_pad, 120).  Same bytes in HBM.
    x_g = x2d.reshape(n_g_pad, IN_G)

    # Block-diagonal weight kron(I_G, W^T): (120, 24); tiled bias: (1, 24).
    w_g = jnp.kron(jnp.eye(GROUP, dtype=weight.dtype), weight.T)
    b_g = jnp.tile(bias, GROUP).reshape(1, OUT_G)

    grid = (n_g_pad // tile_g,)

    cost = pl.CostEstimate(
        flops=2 * n_pad * IN_FEATURES * OUT_FEATURES,
        transcendentals=0,
        bytes_accessed=4 * (n_pad * (IN_FEATURES + OUT_FEATURES)
                            + IN_G * OUT_G + OUT_G),
    )

    y_g = pl.pallas_call(
        _linear_grouped_kernel,
        out_shape=jax.ShapeDtypeStruct((n_g_pad, OUT_G), x.dtype),
        grid_spec=pl.GridSpec(
            grid=grid,
            in_specs=[
                # x tiled along grouped rows; last block dim equals the full array
                # dim (120), second-last is a multiple of 8.
                pl.BlockSpec((tile_g, IN_G), lambda i: (i, 0)),
                # Weight / bias: constant index_map -> single DMA, VMEM-resident.
                pl.BlockSpec((IN_G, OUT_G), lambda i: (0, 0)),
                pl.BlockSpec((1, OUT_G), lambda i: (0, 0)),
            ],
            out_specs=pl.BlockSpec((tile_g, OUT_G), lambda i: (i, 0)),
        ),
        compiler_params=pltpu.CompilerParams(
            # Independent tiles -> parallel: enables megacore sharding on v7x,
            # no cost on v5e/v6e.
            dimension_semantics=("parallel",),
            # Explicit scoped-VMEM budget with plenty of headroom for the
            # double-buffered ~4 MiB working set (safe on v5e/v6e/v7x).
            vmem_limit_bytes=32 * 1024 * 1024,
        ),
        cost_estimate=cost,
    )(x_g, w_g, b_g)

    # Free reshape back to per-row outputs, drop padded rows, restore leading dims.
    out = y_g.reshape(n_pad, OUT_FEATURES)[:n]
    return out.reshape(*orig_shape[:-1], OUT_FEATURES)


if __name__ == "__main__":
    key = jax.random.PRNGKey(0)
    kx, kw, kb = jax.random.split(key, 3)

    # Deterministic synthetic parameters (shapes from nn.Linear(20, 4)).
    weight = jax.random.normal(kw, (OUT_FEATURES, IN_FEATURES), dtype=jnp.float32) * 0.1
    bias = jax.random.normal(kb, (OUT_FEATURES,), dtype=jnp.float32) * 0.1

    # Small example input consistent with the module: (batch=2, seq=8, 20).
    x = jax.random.normal(kx, (2, 8, IN_FEATURES), dtype=jnp.float32)

    y = patchifier_forward(x, weight, bias)
    y = jax.block_until_ready(y)

    # Reference check against plain JAX (same math as torch.nn.Linear).
    y_ref = x @ weight.T + bias
    assert y.shape == (2, 8, OUT_FEATURES), y.shape
    assert jnp.allclose(y, y_ref, atol=1e-5, rtol=1e-5), "mismatch vs reference"

    print("KERNEL_OK")
</pallas_src>

<mosaic_0001>
module attributes {stable_mosaic.version = 11 : i64} {
  func.func @_linear_grouped_kernel(%arg0: i32, %arg1: memref<8x120xf32, #tpu.memory_space<vmem>>, %arg2: memref<120x24xf32, #tpu.memory_space<vmem>>, %arg3: memref<1x24xf32, #tpu.memory_space<vmem>>, %arg4: memref<8x24xf32, #tpu.memory_space<vmem>>) attributes {dimension_semantics = [#tpu.dimension_semantics<parallel>], iteration_bounds = array<i64: 1>, scalar_prefetch = 0 : i64, scratch_operands = 0 : i64, tpu.core_type = #tpu.core_type<tc>, window_params = [{transform_indices = @transform_0, window_bounds = array<i64: 8, 120>}, {pipeline_mode = #tpu.pipeline_mode<synchronous>, transform_indices = @transform_1, window_bounds = array<i64: 120, 24>}, {pipeline_mode = #tpu.pipeline_mode<synchronous>, transform_indices = @transform_2, window_bounds = array<i64: 1, 24>}, {transform_indices = @transform_3, window_bounds = array<i64: 8, 24>}]} {
    %c0 = arith.constant 0 : index
    %c0_0 = arith.constant 0 : index
    %0 = vector.load %arg1[%c0, %c0_0] : memref<8x120xf32, #tpu.memory_space<vmem>>, vector<8x120xf32>
    %c0_1 = arith.constant 0 : index
    %c0_2 = arith.constant 0 : index
    %1 = vector.load %arg2[%c0_1, %c0_2] : memref<120x24xf32, #tpu.memory_space<vmem>>, vector<120x24xf32>
    %cst = arith.constant dense<0.000000e+00> : vector<8x24xf32>
    %2 = tpu.matmul %0, %1, %cst {dimension_numbers = #tpu.dot_dimension_numbers<[1], [0], [0], [1], [0, 0, 1, 1], [], []>} : vector<8x120xf32>, vector<120x24xf32>, vector<8x24xf32> -> vector<8x24xf32>
    %c0_3 = arith.constant 0 : index
    %c0_4 = arith.constant 0 : index
    %3 = vector.load %arg3[%c0_3, %c0_4] : memref<1x24xf32, #tpu.memory_space<vmem>>, vector<1x24xf32>
    %4 = vector.broadcast %3 : vector<1x24xf32> to vector<8x24xf32>
    %5 = arith.addf %2, %4 : vector<8x24xf32>
    %c0_5 = arith.constant 0 : index
    %c0_6 = arith.constant 0 : index
    %6 = vector.load %arg4[%c0_5, %c0_6] : memref<8x24xf32, #tpu.memory_space<vmem>>, vector<8x24xf32>
    tpu.vector_store %arg4[%c0_5, %c0_6], %5 {strides = array<i32>} : memref<8x24xf32, #tpu.memory_space<vmem>>, vector<8x24xf32>,
    return
  }
  func.func @transform_0(%arg0: i32) -> (i32, i32) {
    %c0_i32 = arith.constant 0 : i32
    %c0_i32_0 = arith.constant 0 : i32
    return %arg0, %c0_i32 : i32, i32
  }
  func.func @transform_1(%arg0: i32) -> (i32, i32) {
    %c0_i32 = arith.constant 0 : i32
    %c0_i32_0 = arith.constant 0 : i32
    %c0_i32_1 = arith.constant 0 : i32
    return %c0_i32, %c0_i32_0 : i32, i32
  }
  func.func @transform_2(%arg0: i32) -> (i32, i32) {
    %c0_i32 = arith.constant 0 : i32
    %c0_i32_0 = arith.constant 0 : i32
    %c0_i32_1 = arith.constant 0 : i32
    return %c0_i32, %c0_i32_0 : i32, i32
  }
  func.func @transform_3(%arg0: i32) -> (i32, i32) {
    %c0_i32 = arith.constant 0 : i32
    %c0_i32_0 = arith.constant 0 : i32
    return %arg0, %c0_i32 : i32, i32
  }
}

</mosaic_0001>

<bundles_post_ra>
// kernel: tpu_custom_call.1
= control target key start
LH: loop header
LB: loop body
LE: loop exit
PB: predicated region body
PF: predicated region fallthrough
CT: control target
= control target key end

     0   :  { %s181_s0 = inlined_call_operand.vmem [shape: f32[8,120], index: 0, kind: input, shape index: {}]   ;;  %s182_s1 = inlined_call_operand.vmem [shape: f32[120,24], index: 1, kind: input, shape index: {}]   ;;  %s183_s2 = inlined_call_operand.vmem [shape: f32[1,24], index: 2, kind: input, shape index: {}]   ;;  %s184_s3 = inlined_call_operand.hbm [shape: f32[8,24], index: 3, kind: output, shape index: {}]  }
   0x1   :  { %v30_v0 = vld [vmem:[%s182_s1 + $0x70] sm:$0xff]  ;;  %v29_v1 = vld [vmem:[%s182_s1 + $0x68] sm:$0xff]  ;;  %v28_v2 = vld [vmem:[%s182_s1 + $0x60] sm:$0xff] }
   0x2   :  { %40 = vmatpush.msra.mxu0 %v30_v0  ;;  %v27_v3 = vld [vmem:[%s182_s1 + $0x58] sm:$0xff]  ;;  %v26_v4 = vld [vmem:[%s182_s1 + $0x50] sm:$0xff] }
   0x4   :  { %41 = vmatpush.msra.mxu0 %v29_v1 }
   0x6   :  { %42 = vmatpush.msra.mxu0 %v28_v2 }
   0x7   :  { %8 = vsyncpa [#allocation3], 0  ;;  %v25_v5 = vld [vmem:[%s182_s1 + $0x48] sm:$0xff]  ;;  %v24_v6 = vld [vmem:[%s182_s1 + $0x40] sm:$0xff]  ;;  %vm35_vm0 = vcmask 982016   ;;  %s106_s19 = smov [#allocation2]  }
   0x8   :  { %43 = vmatpush.msra.mxu0 %v27_v3  ;;  %v23_v7 = vld [vmem:[%s182_s1 + $0x38] sm:$0xff]  ;;  %v22_v8 = vld [vmem:[%s182_s1 + $0x30] sm:$0xff]  ;;  %v21_v9 = vld [vmem:[%s182_s1 + $0x28] sm:$0xff]  ;;  %s66_s20 = sshll.u32 %s106_s19, 4  ;;  %s68_s23 = sshll.u32 %s184_s3, 4  ;;  %vm59_vm1 = vcmask 195584   ;;  %s67_s20 = int_to_ptr.vmem [resolvable:$true] %s66_s20  ;;  %s69_s23 = int_to_ptr.hbm [resolvable:$true] %s68_s23 }
   0x9   :  { %v20_v10 = vld [vmem:[%s182_s1 + $0x20] sm:$0xff]  ;;  %v19_v11 = vld [vmem:[%s182_s1 + $0x18] sm:$0xff]  ;;  %v18_v12 = vld [vmem:[%s182_s1 + $0x10] sm:$0xff] }
   0xa   :  { %44 = vmatpush.msra.mxu0 %v26_v4  ;;  %v17_v13 = vld [vmem:[%s182_s1 + $0x8] sm:$0xff]  ;;  %v16_v14 = vld [vmem:[%s182_s1] sm:$0xff] }
   0xb   :  { %v15_v15 = vld [vmem:[%s181_s0] sm:$0xff] }
   0xc   :  { %45 = vmatpush.msra.mxu0 %v25_v5  ;;  %v79_v16 = vld [vmem:[%s183_s2] ss:$0 sm:$0xff] }
   0xe   :  { %46 = vmatpush.msra.mxu0 %v24_v6 }
  0x10   :  { %47 = vmatpush.msra.mxu0 %v23_v7 }
  0x12   :  { %48 = vmatpush.msra.mxu0 %v22_v8 }
  0x14   :  { %49 = vmatpush.msra.mxu0 %v21_v9 }
  0x16   :  { %50 = vmatpush.msra.mxu0 %v20_v10 }
  0x18   :  { %51 = vmatpush.msra.mxu0 %v19_v11 }
  0x1a   :  { %52 = vmatpush.msra.mxu0 %v18_v12 }
  0x1c   :  { %53 = vmatpush.msra.mxu0 %v17_v13 }
  0x1e   :  { %54 = vmatpush.msra.mxu0 %v16_v14 }
  0x1f   :  { %77 = vmatmul.msk.f32.vlgmr.msra.gmra.mxu0 %vm35_vm0, %v15_v15 }
  0x9c   :  { %v56_v17 = vpop.f32.mrf.mxu0 }
  0x9d   :  { %v57_v18 = vadd.f32 %v79_v16, %v56_v17 }
  0x9f   :  { %60 = vst.msk [vmem:[#allocation2] sm:$0xff] %vm59_vm1, %v57_v18 }
  0xa0   :  { %71 = dma.vmem_to_hbm [thread:$0]  %s67_s20, 128, %s69_s23, [#allocation3]  }
  0xa1   :  { %104 = dma.done.wait [#allocation3], 128  }
  0xa2   :  { %105 = vsyncadd [#allocation3], 4294967168 }
  0xa3   :  { %76 = vsyncpa [#allocation3], 1 }

</bundles_post_ra>
